<compile_context>
chip_gen: v5e
topology: v5e:2x2
jax: 0.10.0
libtpu: 0.0.40
codegen_flags: <defaults>
</compile_context>

<pallas_src>
import jax
import jax.numpy as jnp
from jax import lax
from jax.experimental import pallas as pl
from jax.experimental.pallas import tpu as pltpu


# ---------------------------------------------------------------------------
# Wrapper-side constants (weights / 0-1 selectors / masks), built once.
# ---------------------------------------------------------------------------
def _band_cat(w_oihw, w_in):
    """Banded conv matrix carrying all three H-taps in one contraction.

    Shape (3*w_in*cin, 2*(w_in//2)*cout).
    Row layout    : kh*(w_in*cin) + j*cin + ci       (== Xcat lane layout)
    Column layout : s*(w_in//2)*cout + wq*cout + co, output width w = 2*wq+s
                    (parity-split so the W-pool is a max of two lane halves).
    W zero-padding is implicit (out-of-range kw taps -> 0).
    """
    w_oihw = jnp.asarray(w_oihw, jnp.float32)
    cout, cin, _, kw_sz = w_oihw.shape
    w_half = w_in // 2
    n_in, n_out = 3 * w_in * cin, 2 * w_half * cout

    row = jnp.arange(n_in)[:, None]
    kh = row // (w_in * cin)
    j = (row % (w_in * cin)) // cin
    ci = row % cin
    col = jnp.arange(n_out)[None, :]
    s = col // (w_half * cout)
    wq = (col % (w_half * cout)) // cout
    co = col % cout
    kw = j - (2 * wq + s) + 1                        # W-tap index
    valid = (kw >= 0) & (kw < kw_sz)
    vals = w_oihw[co, ci, kh, jnp.clip(kw, 0, kw_sz - 1)]
    return jnp.where(valid, vals, 0.0)


def _bias_row(b, n_cols):
    b = jnp.asarray(b, jnp.float32)
    return b[jnp.arange(n_cols) % b.shape[0]].reshape(1, n_cols)


def _pool_select(tb, h_in):
    """Block-diagonal 0/1 even-row selector, (tb*h_in//2, tb*h_in)."""
    h_out = h_in // 2
    r = jnp.arange(tb * h_out)
    src = (r // h_out) * h_in + 2 * (r % h_out)
    return (jnp.arange(tb * h_in)[None, :] == src[:, None]).astype(jnp.float32)


def _edge_masks(tb, h):
    """(tb*h, 2): col0 zeroes the first row of each packed image (h-1 shift),
    col1 zeroes the last row of each packed image (h+1 shift)."""
    r = jnp.arange(tb * h) % h
    return jnp.stack([(r != 0).astype(jnp.float32),
                      (r != h - 1).astype(jnp.float32)], axis=1)


# ---------------------------------------------------------------------------
# Kernel body (4 matmuls per grid step; all activations stay in vregs/VMEM).
# ---------------------------------------------------------------------------
def _rows_down(x):   # out[r] = x[r-1], out[0] = 0      (sublane shift, no MXU)
    return jnp.concatenate(
        [jnp.zeros((1, x.shape[1]), x.dtype), x[:-1, :]], axis=0)


def _rows_up(x):     # out[r] = x[r+1], out[last] = 0
    return jnp.concatenate(
        [x[1:, :], jnp.zeros((1, x.shape[1]), x.dtype)], axis=0)


def _conv3x3_relu_wpool(x, band_ref, bias_ref, mask_ref):
    """3x3 'same' conv (single banded matmul) + bias + ReLU + 2x1 W-max-pool."""
    mk = mask_ref[...]
    x_up = _rows_down(x) * mk[:, 0:1]     # tap kh=0: input row h-1 (per image)
    x_dn = _rows_up(x) * mk[:, 1:2]       # tap kh=2: input row h+1 (per image)
    xcat = jnp.concatenate([x_up, x, x_dn], axis=1)
    y = jnp.dot(xcat, band_ref[...], preferred_element_type=jnp.float32)
    y = jnp.maximum(y + bias_ref[...], 0.0)
    half = y.shape[1] // 2                # columns are W-parity split
    return jnp.maximum(y[:, :half], y[:, half:])


def _hpool(m, sel_ref):
    """2x1 H-max-pool: pairwise row max + block-diag even-row selection."""
    a = jnp.maximum(m, _rows_up(m))       # a[r] = max(m[r], m[r+1]), ReLU'd -> >=0
    return jnp.dot(sel_ref[...], a, preferred_element_type=jnp.float32)


def _fused_cnn_kernel(x_ref, band1_ref, bias1_ref, band2_ref, bias2_ref,
                      sel1_ref, sel2_ref, mk1_ref, mk2_ref, o_ref):
    x = x_ref[...]                                                # (TB*H,  W)
    m1 = _conv3x3_relu_wpool(x, band1_ref, bias1_ref, mk1_ref)    # (TB*H,  W/2*c1)
    z1 = _hpool(m1, sel1_ref)                                     # (TB*H/2, W/2*c1)
    m2 = _conv3x3_relu_wpool(z1, band2_ref, bias2_ref, mk2_ref)   # (TB*H/2, W/4*c2)
    z2 = _hpool(m2, sel2_ref)                                     # (TB*H/4, W/4*c2)
    o_ref[...] = z2.astype(o_ref.dtype)


# ---------------------------------------------------------------------------
# Wrapper
# ---------------------------------------------------------------------------
def _pick_tb(n, h4):
    """Images per grid step: fill sublanes, keep >=2 grid steps when possible
    (two v7x TensorCores), respect the (8,128) sublane tiling constraint."""
    cands = [tb for tb in (8, 4, 2, 1)
             if n % tb == 0 and ((tb * h4) % 8 == 0 or tb == n)]
    for tb in cands:
        if n // tb >= 2:
            return tb
    return cands[0]


def small_cnn_forward(x_nchw, params):
    N, cin, H, W = x_nchw.shape
    assert cin == 1 and H % 4 == 0 and W % 4 == 0
    c1 = params["w1"].shape[0]
    c2 = params["w2"].shape[0]
    H2, W2, H4, W4 = H // 2, W // 2, H // 4, W // 4
    half1, half2 = W2 * c1, W4 * c2
    nf = c2 * H4 * W4

    TB = _pick_tb(N, H4)
    assert N % TB == 0 and ((TB * H4) % 8 == 0 or TB == N)
    steps = N // TB

    # Weight-only / 0-1 constants (fetched once; constant block indices).
    band1 = _band_cat(params["w1"], W)          # (3*W,       2*half1)
    bias1 = _bias_row(params["b1"], 2 * half1)  # (1,         2*half1)
    band2 = _band_cat(params["w2"], W2)         # (3*W2*c1,   2*half2)
    bias2 = _bias_row(params["b2"], 2 * half2)  # (1,         2*half2)
    sel1 = _pool_select(TB, H)                  # (TB*H2, TB*H)   block-diag
    sel2 = _pool_select(TB, H2)                 # (TB*H4, TB*H2)  block-diag
    mk1 = _edge_masks(TB, H)                    # (TB*H,  2)
    mk2 = _edge_masks(TB, H2)                   # (TB*H2, 2)

    x2d = x_nchw.reshape(N * H, W).astype(jnp.float32)

    const = lambda i: (0, 0)
    flops_step = (2 * (TB * H) * band1.shape[0] * band1.shape[1]
                  + 2 * (TB * H2) * band2.shape[0] * band2.shape[1]
                  + 2 * sel1.shape[0] * sel1.shape[1] * half1
                  + 2 * sel2.shape[0] * sel2.shape[1] * half2)
    bytes_accessed = 4 * (x2d.size + N * H4 * half2 + band1.size + band2.size
                          + bias1.size + bias2.size + sel1.size + sel2.size
                          + mk1.size + mk2.size)

    out2d = pl.pallas_call(
        _fused_cnn_kernel,
        out_shape=jax.ShapeDtypeStruct((N * H4, half2), jnp.float32),
        grid=(steps,),
        in_specs=[
            pl.BlockSpec((TB * H, W), lambda i: (i, 0)),   # TB images / step
            pl.BlockSpec(band1.shape, const),
            pl.BlockSpec(bias1.shape, const),
            pl.BlockSpec(band2.shape, const),
            pl.BlockSpec(bias2.shape, const),
            pl.BlockSpec(sel1.shape, const),
            pl.BlockSpec(sel2.shape, const),
            pl.BlockSpec(mk1.shape, const),
            pl.BlockSpec(mk2.shape, const),
        ],
        out_specs=pl.BlockSpec((TB * H4, half2), lambda i: (i, 0)),
        compiler_params=pltpu.CompilerParams(
            dimension_semantics=("parallel",)),
        cost_estimate=pl.CostEstimate(
            flops=int(flops_step * steps), transcendentals=0,
            bytes_accessed=int(bytes_accessed)),
    )(x2d, band1, bias1, band2, bias2, sel1, sel2, mk1, mk2)

    # Kernel rows are (image, h4), lanes are (w4, c2): finish NCHW flatten
    # order with a tiny XLA transpose on the already lane-dense result.
    return (out2d.reshape(N, H4, W4, c2)
                 .transpose(0, 3, 1, 2)
                 .reshape(N, nf))


def init_params(key):
    k1, k2, k3, k4 = jax.random.split(key, 4)
    return {
        "w1": 0.1 * jax.random.normal(k1, (16, 1, 3, 3), jnp.float32),
        "b1": 0.1 * jax.random.normal(k2, (16,), jnp.float32),
        "w2": 0.1 * jax.random.normal(k3, (32, 16, 3, 3), jnp.float32),
        "b2": 0.1 * jax.random.normal(k4, (32,), jnp.float32),
    }


# Pure-JAX reference (correctness check only).
def ref_forward(x, params):
    def conv(x, w, b):
        y = lax.conv_general_dilated(
            x, w, window_strides=(1, 1), padding=((1, 1), (1, 1)),
            dimension_numbers=("NCHW", "OIHW", "NCHW"),
            precision=lax.Precision.HIGHEST)
        return jax.nn.relu(y + b.reshape(1, -1, 1, 1))

    def pool(x):
        return lax.reduce_window(x, -jnp.inf, lax.max,
                                 (1, 1, 2, 2), (1, 1, 2, 2), "VALID")

    y = pool(conv(x, params["w1"], params["b1"]))
    y = pool(conv(y, params["w2"], params["b2"]))
    return y.reshape(y.shape[0], -1)


if __name__ == "__main__":
    key = jax.random.PRNGKey(0)
    pkey, xkey = jax.random.split(key)
    params = init_params(pkey)

    # Conv2d(1, ...) => single input channel; N=2, 16x16 spatial.
    x = jax.random.normal(xkey, (2, 1, 16, 16), jnp.float32)

    out = jax.jit(small_cnn_forward)(x, params)
    out = jax.block_until_ready(out)

    ref = ref_forward(x, params)
    assert out.shape == (2, 32 * 4 * 4), out.shape
    assert jnp.allclose(out, ref, rtol=2e-3, atol=2e-3), \
        float(jnp.max(jnp.abs(out - ref)))

    print("KERNEL_OK")
</pallas_src>

<mosaic_0001>
module attributes {stable_mosaic.version = 11 : i64} {
  func.func @_fused_cnn_kernel(%arg0: i32, %arg1: memref<32x16xf32, #tpu.memory_space<vmem>>, %arg2: memref<48x256xf32, #tpu.memory_space<vmem>>, %arg3: memref<1x256xf32, #tpu.memory_space<vmem>>, %arg4: memref<384x256xf32, #tpu.memory_space<vmem>>, %arg5: memref<1x256xf32, #tpu.memory_space<vmem>>, %arg6: memref<16x32xf32, #tpu.memory_space<vmem>>, %arg7: memref<8x16xf32, #tpu.memory_space<vmem>>, %arg8: memref<32x2xf32, #tpu.memory_space<vmem>>, %arg9: memref<16x2xf32, #tpu.memory_space<vmem>>, %arg10: memref<8x128xf32, #tpu.memory_space<vmem>>) attributes {dimension_semantics = [#tpu.dimension_semantics<parallel>], iteration_bounds = array<i64: 1>, scalar_prefetch = 0 : i64, scratch_operands = 0 : i64, tpu.core_type = #tpu.core_type<tc>, window_params = [{transform_indices = @transform_0, window_bounds = array<i64: 32, 16>}, {pipeline_mode = #tpu.pipeline_mode<synchronous>, transform_indices = @transform_1, window_bounds = array<i64: 48, 256>}, {pipeline_mode = #tpu.pipeline_mode<synchronous>, transform_indices = @transform_2, window_bounds = array<i64: 1, 256>}, {pipeline_mode = #tpu.pipeline_mode<synchronous>, transform_indices = @transform_3, window_bounds = array<i64: 384, 256>}, {pipeline_mode = #tpu.pipeline_mode<synchronous>, transform_indices = @transform_4, window_bounds = array<i64: 1, 256>}, {pipeline_mode = #tpu.pipeline_mode<synchronous>, transform_indices = @transform_5, window_bounds = array<i64: 16, 32>}, {pipeline_mode = #tpu.pipeline_mode<synchronous>, transform_indices = @transform_6, window_bounds = array<i64: 8, 16>}, {pipeline_mode = #tpu.pipeline_mode<synchronous>, transform_indices = @transform_7, window_bounds = array<i64: 32, 2>}, {pipeline_mode = #tpu.pipeline_mode<synchronous>, transform_indices = @transform_8, window_bounds = array<i64: 16, 2>}, {transform_indices = @transform_9, window_bounds = array<i64: 8, 128>}]} {
    %c0 = arith.constant 0 : index
    %c0_0 = arith.constant 0 : index
    %0 = vector.load %arg1[%c0, %c0_0] : memref<32x16xf32, #tpu.memory_space<vmem>>, vector<32x16xf32>
    %c0_1 = arith.constant 0 : index
    %c0_2 = arith.constant 0 : index
    %1 = vector.load %arg8[%c0_1, %c0_2] : memref<32x2xf32, #tpu.memory_space<vmem>>, vector<32x2xf32>
    %cst = arith.constant 0.000000e+00 : f32
    %2 = vector.broadcast %cst : f32 to vector<1x16xf32>
    %3 = vector.extract_strided_slice %0 {offsets = [0, 0], sizes = [31, 16], strides = [1, 1]} : vector<32x16xf32> to vector<31x16xf32>
    %4 = tpu.concatenate %2, %3 in 0 : vector<1x16xf32>, vector<31x16xf32> -> vector<32x16xf32>
    %5 = vector.extract_strided_slice %1 {offsets = [0, 0], sizes = [32, 1], strides = [1, 1]} : vector<32x2xf32> to vector<32x1xf32>
    %6 = vector.broadcast %5 : vector<32x1xf32> to vector<32x16xf32>
    %7 = arith.mulf %4, %6 : vector<32x16xf32>
    %8 = vector.extract_strided_slice %0 {offsets = [1, 0], sizes = [31, 16], strides = [1, 1]} : vector<32x16xf32> to vector<31x16xf32>
    %cst_3 = arith.constant 0.000000e+00 : f32
    %9 = vector.broadcast %cst_3 : f32 to vector<1x16xf32>
    %10 = tpu.concatenate %8, %9 in 0 : vector<31x16xf32>, vector<1x16xf32> -> vector<32x16xf32>
    %11 = vector.extract_strided_slice %1 {offsets = [0, 1], sizes = [32, 1], strides = [1, 1]} : vector<32x2xf32> to vector<32x1xf32>
    %12 = vector.broadcast %11 : vector<32x1xf32> to vector<32x16xf32>
    %13 = arith.mulf %10, %12 : vector<32x16xf32>
    %14 = tpu.concatenate %7, %0, %13 in 1 : vector<32x16xf32>, vector<32x16xf32>, vector<32x16xf32> -> vector<32x48xf32>
    %c0_4 = arith.constant 0 : index
    %c0_5 = arith.constant 0 : index
    %15 = vector.load %arg2[%c0_4, %c0_5] : memref<48x256xf32, #tpu.memory_space<vmem>>, vector<48x256xf32>
    %cst_6 = arith.constant dense<0.000000e+00> : vector<32x256xf32>
    %16 = tpu.matmul %14, %15, %cst_6 {dimension_numbers = #tpu.dot_dimension_numbers<[1], [0], [0], [1], [0, 0, 1, 1], [], []>} : vector<32x48xf32>, vector<48x256xf32>, vector<32x256xf32> -> vector<32x256xf32>
    %c0_7 = arith.constant 0 : index
    %c0_8 = arith.constant 0 : index
    %17 = vector.load %arg3[%c0_7, %c0_8] : memref<1x256xf32, #tpu.memory_space<vmem>>, vector<1x256xf32>
    %18 = vector.broadcast %17 : vector<1x256xf32> to vector<32x256xf32>
    %19 = arith.addf %16, %18 : vector<32x256xf32>
    %cst_9 = arith.constant 0.000000e+00 : f32
    %20 = vector.broadcast %cst_9 : f32 to vector<32x256xf32>
    %21 = arith.maximumf %19, %20 : vector<32x256xf32>
    %22 = vector.extract_strided_slice %21 {offsets = [0, 0], sizes = [32, 128], strides = [1, 1]} : vector<32x256xf32> to vector<32x128xf32>
    %23 = vector.extract_strided_slice %21 {offsets = [0, 128], sizes = [32, 128], strides = [1, 1]} : vector<32x256xf32> to vector<32x128xf32>
    %24 = arith.maximumf %22, %23 : vector<32x128xf32>
    %25 = vector.extract_strided_slice %24 {offsets = [1, 0], sizes = [31, 128], strides = [1, 1]} : vector<32x128xf32> to vector<31x128xf32>
    %cst_10 = arith.constant 0.000000e+00 : f32
    %26 = vector.broadcast %cst_10 : f32 to vector<1x128xf32>
    %27 = tpu.concatenate %25, %26 in 0 : vector<31x128xf32>, vector<1x128xf32> -> vector<32x128xf32>
    %28 = arith.maximumf %24, %27 : vector<32x128xf32>
    %c0_11 = arith.constant 0 : index
    %c0_12 = arith.constant 0 : index
    %29 = vector.load %arg6[%c0_11, %c0_12] : memref<16x32xf32, #tpu.memory_space<vmem>>, vector<16x32xf32>
    %cst_13 = arith.constant dense<0.000000e+00> : vector<16x128xf32>
    %30 = tpu.matmul %29, %28, %cst_13 {dimension_numbers = #tpu.dot_dimension_numbers<[1], [0], [0], [1], [0, 0, 1, 1], [], []>} : vector<16x32xf32>, vector<32x128xf32>, vector<16x128xf32> -> vector<16x128xf32>
    %c0_14 = arith.constant 0 : index
    %c0_15 = arith.constant 0 : index
    %31 = vector.load %arg9[%c0_14, %c0_15] : memref<16x2xf32, #tpu.memory_space<vmem>>, vector<16x2xf32>
    %cst_16 = arith.constant 0.000000e+00 : f32
    %32 = vector.broadcast %cst_16 : f32 to vector<1x128xf32>
    %33 = vector.extract_strided_slice %30 {offsets = [0, 0], sizes = [15, 128], strides = [1, 1]} : vector<16x128xf32> to vector<15x128xf32>
    %34 = tpu.concatenate %32, %33 in 0 : vector<1x128xf32>, vector<15x128xf32> -> vector<16x128xf32>
    %35 = vector.extract_strided_slice %31 {offsets = [0, 0], sizes = [16, 1], strides = [1, 1]} : vector<16x2xf32> to vector<16x1xf32>
    %36 = vector.broadcast %35 : vector<16x1xf32> to vector<16x128xf32>
    %37 = arith.mulf %34, %36 : vector<16x128xf32>
    %38 = vector.extract_strided_slice %30 {offsets = [1, 0], sizes = [15, 128], strides = [1, 1]} : vector<16x128xf32> to vector<15x128xf32>
    %cst_17 = arith.constant 0.000000e+00 : f32
    %39 = vector.broadcast %cst_17 : f32 to vector<1x128xf32>
    %40 = tpu.concatenate %38, %39 in 0 : vector<15x128xf32>, vector<1x128xf32> -> vector<16x128xf32>
    %41 = vector.extract_strided_slice %31 {offsets = [0, 1], sizes = [16, 1], strides = [1, 1]} : vector<16x2xf32> to vector<16x1xf32>
    %42 = vector.broadcast %41 : vector<16x1xf32> to vector<16x128xf32>
    %43 = arith.mulf %40, %42 : vector<16x128xf32>
    %44 = tpu.concatenate %37, %30, %43 in 1 : vector<16x128xf32>, vector<16x128xf32>, vector<16x128xf32> -> vector<16x384xf32>
    %c0_18 = arith.constant 0 : index
    %c0_19 = arith.constant 0 : index
    %45 = vector.load %arg4[%c0_18, %c0_19] : memref<384x256xf32, #tpu.memory_space<vmem>>, vector<384x256xf32>
    %cst_20 = arith.constant dense<0.000000e+00> : vector<16x256xf32>
    %46 = tpu.matmul %44, %45, %cst_20 {dimension_numbers = #tpu.dot_dimension_numbers<[1], [0], [0], [1], [0, 0, 1, 1], [], []>} : vector<16x384xf32>, vector<384x256xf32>, vector<16x256xf32> -> vector<16x256xf32>
    %c0_21 = arith.constant 0 : index
    %c0_22 = arith.constant 0 : index
    %47 = vector.load %arg5[%c0_21, %c0_22] : memref<1x256xf32, #tpu.memory_space<vmem>>, vector<1x256xf32>
    %48 = vector.broadcast %47 : vector<1x256xf32> to vector<16x256xf32>
    %49 = arith.addf %46, %48 : vector<16x256xf32>
    %cst_23 = arith.constant 0.000000e+00 : f32
    %50 = vector.broadcast %cst_23 : f32 to vector<16x256xf32>
    %51 = arith.maximumf %49, %50 : vector<16x256xf32>
    %52 = vector.extract_strided_slice %51 {offsets = [0, 0], sizes = [16, 128], strides = [1, 1]} : vector<16x256xf32> to vector<16x128xf32>
    %53 = vector.extract_strided_slice %51 {offsets = [0, 128], sizes = [16, 128], strides = [1, 1]} : vector<16x256xf32> to vector<16x128xf32>
    %54 = arith.maximumf %52, %53 : vector<16x128xf32>
    %55 = vector.extract_strided_slice %54 {offsets = [1, 0], sizes = [15, 128], strides = [1, 1]} : vector<16x128xf32> to vector<15x128xf32>
    %cst_24 = arith.constant 0.000000e+00 : f32
    %56 = vector.broadcast %cst_24 : f32 to vector<1x128xf32>
    %57 = tpu.concatenate %55, %56 in 0 : vector<15x128xf32>, vector<1x128xf32> -> vector<16x128xf32>
    %58 = arith.maximumf %54, %57 : vector<16x128xf32>
    %c0_25 = arith.constant 0 : index
    %c0_26 = arith.constant 0 : index
    %59 = vector.load %arg7[%c0_25, %c0_26] : memref<8x16xf32, #tpu.memory_space<vmem>>, vector<8x16xf32>
    %cst_27 = arith.constant dense<0.000000e+00> : vector<8x128xf32>
    %60 = tpu.matmul %59, %58, %cst_27 {dimension_numbers = #tpu.dot_dimension_numbers<[1], [0], [0], [1], [0, 0, 1, 1], [], []>} : vector<8x16xf32>, vector<16x128xf32>, vector<8x128xf32> -> vector<8x128xf32>
    %c0_28 = arith.constant 0 : index
    %c0_29 = arith.constant 0 : index
    %61 = vector.load %arg10[%c0_28, %c0_29] : memref<8x128xf32, #tpu.memory_space<vmem>>, vector<8x128xf32>
    tpu.vector_store %arg10[%c0_28, %c0_29], %60 {strides = array<i32>} : memref<8x128xf32, #tpu.memory_space<vmem>>, vector<8x128xf32>,
    return
  }
  func.func @transform_0(%arg0: i32) -> (i32, i32) {
    %c0_i32 = arith.constant 0 : i32
    %c0_i32_0 = arith.constant 0 : i32
    return %arg0, %c0_i32 : i32, i32
  }
  func.func @transform_1(%arg0: i32) -> (i32, i32) {
    %c0_i32 = arith.constant 0 : i32
    %c0_i32_0 = arith.constant 0 : i32
    %c0_i32_1 = arith.constant 0 : i32
    return %c0_i32, %c0_i32_0 : i32, i32
  }
  func.func @transform_2(%arg0: i32) -> (i32, i32) {
    %c0_i32 = arith.constant 0 : i32
    %c0_i32_0 = arith.constant 0 : i32
    %c0_i32_1 = arith.constant 0 : i32
    return %c0_i32, %c0_i32_0 : i32, i32
  }
  func.func @transform_3(%arg0: i32) -> (i32, i32) {
    %c0_i32 = arith.constant 0 : i32
    %c0_i32_0 = arith.constant 0 : i32
    %c0_i32_1 = arith.constant 0 : i32
    return %c0_i32, %c0_i32_0 : i32, i32
  }
  func.func @transform_4(%arg0: i32) -> (i32, i32) {
    %c0_i32 = arith.constant 0 : i32
    %c0_i32_0 = arith.constant 0 : i32
    %c0_i32_1 = arith.constant 0 : i32
    return %c0_i32, %c0_i32_0 : i32, i32
  }
  func.func @transform_5(%arg0: i32) -> (i32, i32) {
    %c0_i32 = arith.constant 0 : i32
    %c0_i32_0 = arith.constant 0 : i32
    %c0_i32_1 = arith.constant 0 : i32
    return %c0_i32, %c0_i32_0 : i32, i32
  }
  func.func @transform_6(%arg0: i32) -> (i32, i32) {
    %c0_i32 = arith.constant 0 : i32
    %c0_i32_0 = arith.constant 0 : i32
    %c0_i32_1 = arith.constant 0 : i32
    return %c0_i32, %c0_i32_0 : i32, i32
  }
  func.func @transform_7(%arg0: i32) -> (i32, i32) {
    %c0_i32 = arith.constant 0 : i32
    %c0_i32_0 = arith.constant 0 : i32
    %c0_i32_1 = arith.constant 0 : i32
    return %c0_i32, %c0_i32_0 : i32, i32
  }
  func.func @transform_8(%arg0: i32) -> (i32, i32) {
    %c0_i32 = arith.constant 0 : i32
    %c0_i32_0 = arith.constant 0 : i32
    %c0_i32_1 = arith.constant 0 : i32
    return %c0_i32, %c0_i32_0 : i32, i32
  }
  func.func @transform_9(%arg0: i32) -> (i32, i32) {
    %c0_i32 = arith.constant 0 : i32
    %c0_i32_0 = arith.constant 0 : i32
    return %arg0, %c0_i32 : i32, i32
  }
}

</mosaic_0001>

<bundles_post_ra>
// kernel: small_cnn_forward.1
= control target key start
LH: loop header
LB: loop body
LE: loop exit
PB: predicated region body
PF: predicated region fallthrough
CT: control target
= control target key end

     0   :  { %v663_v0 = vmov 1   ;;  %v664_v3 = vmov 0   ;;  %s665_s19 = smov 16   ;;  %vm81_vm0 = vcmask 1046528   ;;  %vm44_vm1 = vcmask 1040384   ;;  %s1146_s7 = inlined_call_operand.vmem [shape: f32[32,2], index: 7, kind: input, shape index: {}]   ;;  %s1147_s0 = inlined_call_operand.vmem [shape: f32[32,16], index: 0, kind: input, shape index: {}]   ;;  %s1148_s8 = inlined_call_operand.vmem [shape: f32[16,2], index: 8, kind: input, shape index: {}]   ;;  %s1149_s1 = inlined_call_operand.vmem [shape: f32[48,256], index: 1, kind: input, shape index: {}]   ;;  %s1150_s2 = inlined_call_operand.vmem [shape: f32[1,256], index: 2, kind: input, shape index: {}]   ;;  %s1151_s3 = inlined_call_operand.vmem [shape: f32[384,256], index: 3, kind: input, shape index: {}]   ;;  %s1152_s5 = inlined_call_operand.vmem [shape: f32[16,32], index: 5, kind: input, shape index: {}]   ;;  %s1153_s4 = inlined_call_operand.vmem [shape: f32[1,256], index: 4, kind: input, shape index: {}]   ;;  %s1154_s6 = inlined_call_operand.vmem [shape: f32[8,16], index: 6, kind: input, shape index: {}]   ;;  %s1155_s9 = inlined_call_operand.vmem [shape: f32[8,128], index: 9, kind: output, shape index: {}]  }
   0x1   :  { %658 = vset.pattern.permute.xlu0 %v663_v0  ;;  %v36_v1 = vld [vmem:[%s1146_s7] sm:$0xff]  ;;  %659 = vset.pattern.permute.xlu1 %v663_v0  ;;  %v38_v2 = vld [vmem:[%s1146_s7 + $0x10] sm:$0xff]  ;;  %v37_v4 = vld [vmem:[%s1146_s7 + $0x8] sm:$0xff]  ;;  %vm142_vm2 = vcmask 130048   ;;  %vm147_vm3 = vcmask 261120   ;;  %vm170_vm4 = vcmask 392192  }
   0x2   :  { %95 = vperm.xlu0 %658, %v36_v1   ;;  %103 = vperm.xlu1 %659, %v38_v2   ;;  %v39_v5 = vld [vmem:[%s1146_s7 + $0x18] sm:$0xff]  ;;  %v732_v6 = vld [vmem:[%s1147_s0] sm:$0xff]  ;;  %v738_v7 = vld [vmem:[%s1147_s0 + $0x8] sm:$0xff] }
   0x3   :  { %660 = vset.pattern.permute.xlu2 %v664_v3  ;;  %v744_v8 = vld [vmem:[%s1147_s0 + $0x10] sm:$0xff]  ;;  %v304_v9 = vld [vmem:[%s1148_s8] sm:$0xff]  ;;  %v753_v10 = vld [vmem:[%s1147_s0 + $0x18] sm:$0xff]  ;;  %v82_v12 = vrot.slane %v732_v6, 1  ;;  %v83_v13 = vrot.slane %v738_v7, 1  ;;  %s666_s0 = smov 32  }
   0x4   :  { %59 = vperm.xlu2 %660, %v36_v1   ;;  %v305_v11 = vld [vmem:[%s1148_s8 + $0x8] sm:$0xff]  ;;  %v85_v17 = vrot.slane %v744_v8, 1  ;;  %v87_v19 = vrot.slane %v753_v10, 1  ;;  %v46_v28 = vrot.slane %v738_v7, 7  ;;  %v48_v29 = vrot.slane %v744_v8, 7  ;;  %v162_v31 = vld [vmem:[%s1149_s1 + $0x50] sm:$0xff] }
   0x5   :  { %v84_v14 = vsel %vm81_vm0, %v82_v12, %v83_v13  ;;  %v163_v32 = vld [vmem:[%s1149_s1 + $0x58] sm:$0xff]  ;;  %193 = vmatpush.msra.mxu0 %v162_v31  ;;  %v160_v33 = vld [vmem:[%s1149_s1 + $0x40] sm:$0xff]  ;;  %v161_v34 = vld [vmem:[%s1149_s1 + $0x48] sm:$0xff]  ;;  %v45_v44 = vrot.slane %v732_v6, 7  ;;  %v50_v61 = vrot.slane %v753_v10, 7 }
   0x6   :  { %v86_v18 = vsel %vm81_vm0, %v83_v13, %v85_v17  ;;  %v88_v23 = vsel %vm81_vm0, %v85_v17, %v87_v19  ;;  %v93_v26 = vsel %vm81_vm0, %v87_v19, 0.0  ;;  %v49_v30 = vsel %vm44_vm1, %v46_v28, %v48_v29  ;;  %222 = vmatpush.msra.mxu1 %v163_v32  ;;  %v158_v35 = vld [vmem:[%s1149_s1 + $0x30] sm:$0xff]  ;;  %v159_v36 = vld [vmem:[%s1149_s1 + $0x38] sm:$0xff]  ;;  %v156_v37 = vld [vmem:[%s1149_s1 + $0x20] sm:$0xff] }
   0x7   :  { %194 = vmatpush.msra.mxu0 %v160_v33  ;;  %v157_v38 = vld [vmem:[%s1149_s1 + $0x28] sm:$0xff]  ;;  %v154_v39 = vld [vmem:[%s1149_s1 + $0x10] sm:$0xff]  ;;  %v155_v40 = vld [vmem:[%s1149_s1 + $0x18] sm:$0xff]  ;;  %v56_v45 = vsel %vm44_vm1, 0.0, %v45_v44  ;;  %v47_v49 = vsel %vm44_vm1, %v45_v44, %v46_v28 }
   0x8   :  { %223 = vmatpush.msra.mxu1 %v161_v34  ;;  %v152_v41 = vld [vmem:[%s1149_s1] sm:$0xff]  ;;  %v153_v42 = vld [vmem:[%s1149_s1 + $0x8] sm:$0xff]  ;;  %v372_v19 = vld [vmem:[%s1151_s3 + $0xf0] sm:$0xff] }
   0x9   :  { %195 = vmatpush.msra.mxu0 %v158_v35  ;;  %v164_v12 = vld [vmem:[%s1150_s2] sm:$0x3]  ;;  %444 = vmatpush.msra.mxu3 %v372_v19  ;;  %v367_v34 = vld [vmem:[%s1151_s3 + $0xc8] sm:$0xff]  ;;  %v432_v19 = vld [vmem:[%s1151_s3 + $0x2d0] sm:$0xff] }
   0xa   :  { %99 = vperm.xlu0 %658, %v37_v4   ;;  %107 = vperm.xlu1 %659, %v39_v5   ;;  %v366_v33 = vld [vmem:[%s1151_s3 + $0xc0] sm:$0xff] }
   0xb   :  { %224 = vmatpush.msra.mxu1 %v159_v36  ;;  %196 = vmatpush.msra.mxu0 %v156_v37 }
   0xc   :  { %114 = vrot.lane.b32.xlu2 %v732_v6, %s665_s19 }
   0xd   :  { %225 = vmatpush.msra.mxu1 %v157_v38  ;;  %197 = vmatpush.msra.mxu0 %v154_v39 }
   0xf   :  { %226 = vmatpush.msra.mxu1 %v155_v40  ;;  %198 = vmatpush.msra.mxu0 %v152_v41  ;;  %v364_v40 = vld [vmem:[%s1151_s3 + $0xb0] sm:$0xff]  ;;  %v365_v41 = vld [vmem:[%s1151_s3 + $0xb8] sm:$0xff] }
  0x11   :  { %227 = vmatpush.msra.mxu1 %v153_v42 }
  0x12   :  { %661 = vset.pattern.permute.xlu1 %v664_v3 }
  0x13   :  { %64 = vperm.xlu1 %661, %v37_v4  }
  0x14   :  { %116 = vrot.lane.b32.xlu2 %v738_v7, %s665_s19 }
  0x1b   :  { %69 = vperm.xlu1 %661, %v38_v2  }
  0x1c   :  { %118 = vrot.lane.b32.xlu2 %v744_v8, %s665_s19 }
  0x23   :  { %74 = vperm.xlu1 %661, %v39_v5  }
  0x24   :  { %120 = vrot.lane.b32.xlu2 %v753_v10, %s665_s19 }
  0x2b   :  { %316 = vperm.xlu1 %661, %v304_v9  }
  0x2c   :  { %321 = vperm.xlu2 %660, %v305_v11  }
  0x33   :  { %662 = vset.pattern.permute.xlu1 %v663_v0  ;;  %v51_v0 = vsel %vm44_vm1, %v48_v29, %v50_v61  ;;  %v356_v61 = vld [vmem:[%s1151_s3 + $0x70] sm:$0xff] }
  0x34   :  { %337 = vperm.xlu1 %662, %v305_v11  }
  0x5e   :  { %v60_v43 = vpop.permute.xlu2 %59 }
  0x5f   :  { %v77_v47 = vmul.f32 %v60_v43, %v56_v45 }
  0x66   :  { %v115_v46 = vpop.permute.xlu2 %114 }
  0x67   :  { %v143_v50 = vsel %vm142_vm2, %v77_v47, %v115_v46  ;;  %v362_v46 = vld [vmem:[%s1151_s3 + $0xa0] sm:$0xff]  ;;  %v363_v47 = vld [vmem:[%s1151_s3 + $0xa8] sm:$0xff] }
  0x6e   :  { %v117_v54 = vpop.permute.xlu2 %116 }
  0x74   :  { %v96_v15 = vpop.permute.xlu0 %95  ;;  %v104_v22 = vpop.permute.xlu1 %103 }
  0x75   :  { %v110_v16 = vmul.f32 %v96_v15, %v84_v14  ;;  %v112_v24 = vmul.f32 %v104_v22, %v88_v23  ;;  %v166_v15 = vperm.slane %v164_v12, 0  ;;  %v370_v23 = vld [vmem:[%s1151_s3 + $0xe0] sm:$0xff] }
  0x76   :  { %v119_v60 = vpop.permute.xlu2 %118  ;;  %445 = vmatpush.msra.mxu3 %v370_v23  ;;  %v430_v23 = vld [vmem:[%s1151_s3 + $0x2c0] sm:$0xff] }
  0x77   :  { %130 = vrot.lane.b32.xlu0 %v110_v16, %s666_s0  ;;  %v167_v16 = vperm.slane %v164_v12, 1  ;;  %v404_v12 = vld [vmem:[%s1151_s3 + $0x1f0] sm:$0xff] }
  0x7c   :  { %v100_v20 = vpop.permute.xlu0 %99  ;;  %v108_v25 = vpop.permute.xlu1 %107 }
  0x7d   :  { %v111_v21 = vmul.f32 %v100_v20, %v86_v18  ;;  %v113_v27 = vmul.f32 %v108_v25, %v93_v26  ;;  %v373_v20 = vld [vmem:[%s1151_s3 + $0xf8] sm:$0xff]  ;;  %v368_v26 = vld [vmem:[%s1151_s3 + $0xd0] sm:$0xff] }
  0x7e   :  { %v121_v4 = vpop.permute.xlu2 %120  ;;  %513 = vmatpush.msrb.mxu1 %v373_v20  ;;  %446 = vmatpush.msra.mxu3 %v368_v26  ;;  %v400_v20 = vld [vmem:[%s1151_s3 + $0x1d0] sm:$0xff]  ;;  %v274_v26 = vld [vmem:[%s1152_s5 + $0x8] sm:$0xff] }
  0x7f   :  { %132 = vrot.lane.b32.xlu0 %v111_v21, %s666_s0 }
  0x80   :  { %447 = vmatpush.msra.mxu3 %v366_v33  ;;  %v426_v33 = vld [vmem:[%s1151_s3 + $0x2a0] sm:$0xff] }
  0x82   :  { %448 = vmatpush.msra.mxu3 %v364_v40  ;;  %v435_v40 = vld [vmem:[%s1151_s3 + $0x2e8] sm:$0xff] }
  0x84   :  { %449 = vmatpush.msra.mxu3 %v362_v46  ;;  %v397_v46 = vld [vmem:[%s1151_s3 + $0x1b8] sm:$0xff] }
  0x85   :  { %v65_v48 = vpop.permute.xlu1 %64 }
  0x86   :  { %v78_v53 = vmul.f32 %v65_v48, %v47_v49 }
  0x87   :  { %134 = vrot.lane.b32.xlu0 %v112_v24, %s666_s0  ;;  %v371_v24 = vld [vmem:[%s1151_s3 + $0xe8] sm:$0xff] }
  0x88   :  { %v144_v55 = vsel %vm142_vm2, %v78_v53, %v117_v54  ;;  %514 = vmatpush.msrb.mxu1 %v371_v24  ;;  %v398_v24 = vld [vmem:[%s1151_s3 + $0x1c0] sm:$0xff] }
  0x8d   :  { %v70_v57 = vpop.permute.xlu1 %69 }
  0x8e   :  { %v79_v59 = vmul.f32 %v70_v57, %v49_v30 }
  0x8f   :  { %136 = vrot.lane.b32.xlu0 %v113_v27, %s666_s0  ;;  %v369_v27 = vld [vmem:[%s1151_s3 + $0xd8] sm:$0xff] }
  0x90   :  { %v145_v63 = vsel %vm142_vm2, %v79_v59, %v119_v60  ;;  %515 = vmatpush.msrb.mxu1 %v369_v27  ;;  %v342_v27 = vld [vmem:[%s1151_s3] sm:$0xff] }
  0x92   :  { %516 = vmatpush.msrb.mxu1 %v367_v34  ;;  %v403_v34 = vld [vmem:[%s1151_s3 + $0x1e8] sm:$0xff] }
  0x94   :  { %517 = vmatpush.msrb.mxu1 %v365_v41  ;;  %v422_v41 = vld [vmem:[%s1151_s3 + $0x280] sm:$0xff] }
  0x95   :  { %v75_v2 = vpop.permute.xlu1 %74 }
  0x96   :  { %v80_v3 = vmul.f32 %v75_v2, %v51_v0  ;;  %518 = vmatpush.msrb.mxu1 %v363_v47  ;;  %v354_v2 = vld [vmem:[%s1151_s3 + $0x60] sm:$0xff] }
  0x97   :  { %333 = vperm.xlu0 %658, %v304_v9   ;;  %v386_v47 = vld [vmem:[%s1151_s3 + $0x160] sm:$0xff] }
  0x98   :  { %v146_v6 = vsel %vm142_vm2, %v80_v3, %v121_v4  ;;  %v355_v3 = vld [vmem:[%s1151_s3 + $0x68] sm:$0xff] }
  0xe9   :  { %v131_v51 = vpop.permute.xlu0 %130 }
  0xea   :  { %v148_v52 = vsel %vm147_vm3, %v143_v50, %v131_v51  ;;  %v360_v50 = vld [vmem:[%s1151_s3 + $0x90] sm:$0xff]  ;;  %v361_v51 = vld [vmem:[%s1151_s3 + $0x98] sm:$0xff] }
  0xeb   :  { %627 = vmatmul.msk.f32.vlgmr.msra.gmra.mxu0 %vm170_vm4, %v148_v52  ;;  %631 = vmatmul.msk.f32.vlgmr.msra.gmra.mxu1 %vm170_vm4, %v148_v52 }
  0xec   :  { %450 = vmatpush.msra.mxu3 %v360_v50  ;;  %519 = vmatpush.msrb.mxu1 %v361_v51  ;;  %v429_v50 = vld [vmem:[%s1151_s3 + $0x2b8] sm:$0xff]  ;;  %v382_v51 = vld [vmem:[%s1151_s3 + $0x140] sm:$0xff] }
  0xf1   :  { %v133_v56 = vpop.permute.xlu0 %132 }
  0xf2   :  { %v149_v58 = vsel %vm147_vm3, %v144_v55, %v133_v56  ;;  %v358_v55 = vld [vmem:[%s1151_s3 + $0x80] sm:$0xff]  ;;  %v359_v56 = vld [vmem:[%s1151_s3 + $0x88] sm:$0xff] }
  0xf3   :  { %628 = vmatmul.msk.f32.gmra.mxu0 %vm170_vm4, %v149_v58  ;;  %632 = vmatmul.msk.f32.gmra.mxu1 %vm170_vm4, %v149_v58 }
  0xf4   :  { %451 = vmatpush.msra.mxu3 %v358_v55  ;;  %520 = vmatpush.msrb.mxu1 %v359_v56  ;;  %v378_v55 = vld [vmem:[%s1151_s3 + $0x120] sm:$0xff]  ;;  %v376_v56 = vld [vmem:[%s1151_s3 + $0x110] sm:$0xff] }
  0xf6   :  { %452 = vmatpush.msra.mxu3 %v356_v61  ;;  %v421_v61 = vld [vmem:[%s1151_s3 + $0x278] sm:$0xff] }
  0xf8   :  { %453 = vmatpush.msra.mxu3 %v354_v2  ;;  %v391_v2 = vld [vmem:[%s1151_s3 + $0x188] sm:$0xff] }
  0xf9   :  { %v135_v62 = vpop.permute.xlu0 %134 }
  0xfa   :  { %v150_v1 = vsel %vm147_vm3, %v145_v63, %v135_v62  ;;  %v357_v62 = vld [vmem:[%s1151_s3 + $0x78] sm:$0xff] }
  0xfb   :  { %629 = vmatmul.msk.f32.gmra.mxu0 %vm170_vm4, %v150_v1  ;;  %633 = vmatmul.msk.f32.gmra.mxu1 %vm170_vm4, %v150_v1 }
  0xfc   :  { %521 = vmatpush.msrb.mxu1 %v357_v62  ;;  %v416_v62 = vld [vmem:[%s1151_s3 + $0x250] sm:$0xff] }
  0xfe   :  { %522 = vmatpush.msrb.mxu1 %v355_v3  ;;  %v417_v3 = vld [vmem:[%s1151_s3 + $0x258] sm:$0xff] }
 0x101   :  { %v137_v5 = vpop.permute.xlu0 %136 }
 0x102   :  { %v151_v7 = vsel %vm147_vm3, %v146_v6, %v137_v5  ;;  %v352_v6 = vld [vmem:[%s1151_s3 + $0x50] sm:$0xff] }
 0x103   :  { %630 = vmatmul.msk.f32.gmra.mxu0 %vm170_vm4, %v151_v7  ;;  %634 = vmatmul.msk.f32.gmra.mxu1 %vm170_vm4, %v151_v7  ;;  %v353_v7 = vld [vmem:[%s1151_s3 + $0x58] sm:$0xff] }
 0x104   :  { %454 = vmatpush.msra.mxu3 %v352_v6  ;;  %523 = vmatpush.msrb.mxu1 %v353_v7  ;;  %v415_v6 = vld [vmem:[%s1151_s3 + $0x248] sm:$0xff]  ;;  %v410_v7 = vld [vmem:[%s1151_s3 + $0x220] sm:$0xff] }
 0x168   :  { %v200_v8 = vpop.f32.mrf.mxu0  ;;  %v229_v9 = vpop.f32.mrf.mxu1 }
 0x169   :  { %v201_v25 = vadd.f32 %v200_v8, %v166_v15  ;;  %v230_v28 = vadd.f32 %v229_v9, %v167_v16  ;;  %v273_v9 = vld [vmem:[%s1152_s5] sm:$0xff] }
 0x16b   :  { %v241_v39 = vmax.f32 %v201_v25, 0.0  ;;  %v242_v42 = vmax.f32 %v230_v28, 0.0  ;;  %v345_v25 = vld [vmem:[%s1151_s3 + $0x18] sm:$0xff]  ;;  %v396_v28 = vld [vmem:[%s1151_s3 + $0x1b0] sm:$0xff] }
 0x16d   :  { %v249_v52 = vmax.f32 %v241_v39, %v242_v42  ;;  %v390_v39 = vld [vmem:[%s1151_s3 + $0x180] sm:$0xff]  ;;  %v399_v42 = vld [vmem:[%s1151_s3 + $0x1c8] sm:$0xff] }
 0x16f   :  { %v257_v63 = vrot.slane %v249_v52, 1 }
 0x170   :  { %v203_v10 = vpop.f32.mrf.mxu0  ;;  %v232_v11 = vpop.f32.mrf.mxu1 }
 0x171   :  { %v204_v21 = vadd.f32 %v203_v10, %v166_v15  ;;  %v233_v22 = vadd.f32 %v232_v11, %v167_v16  ;;  %v350_v10 = vld [vmem:[%s1151_s3 + $0x40] sm:$0xff]  ;;  %v436_v11 = vld [vmem:[%s1151_s3 + $0x2f0] sm:$0xff] }
 0x172   :  { %490 = vmatpush.msrb.mxu0 %v436_v11  ;;  %455 = vmatpush.msra.mxu3 %v350_v10  ;;  %v408_v10 = vld [vmem:[%s1151_s3 + $0x210] sm:$0xff]  ;;  %v385_v11 = vld [vmem:[%s1151_s3 + $0x158] sm:$0xff] }
 0x173   :  { %v243_v35 = vmax.f32 %v204_v21, 0.0  ;;  %v244_v36 = vmax.f32 %v233_v22, 0.0  ;;  %v347_v21 = vld [vmem:[%s1151_s3 + $0x28] sm:$0xff]  ;;  %v344_v22 = vld [vmem:[%s1151_s3 + $0x10] sm:$0xff] }
 0x175   :  { %v250_v48 = vmax.f32 %v243_v35, %v244_v36  ;;  %v392_v35 = vld [vmem:[%s1151_s3 + $0x190] sm:$0xff]  ;;  %v437_v36 = vld [vmem:[%s1151_s3 + $0x2f8] sm:$0xff] }
 0x177   :  { %v258_v57 = vrot.slane %v250_v48, 1 }
 0x178   :  { %v206_v13 = vpop.f32.mrf.mxu0  ;;  %v235_v14 = vpop.f32.mrf.mxu1 }
 0x179   :  { %v207_v17 = vadd.f32 %v206_v13, %v166_v15  ;;  %v236_v18 = vadd.f32 %v235_v14, %v167_v16  ;;  %v259_v4 = vsel %vm81_vm0, %v257_v63, %v258_v57  ;;  %v351_v13 = vld [vmem:[%s1151_s3 + $0x48] sm:$0xff]  ;;  %v348_v14 = vld [vmem:[%s1151_s3 + $0x30] sm:$0xff]  ;;  %v393_v63 = vld [vmem:[%s1151_s3 + $0x198] sm:$0xff] }
 0x17a   :  { %v269_v8 = vmax.f32 %v249_v52, %v259_v4  ;;  %524 = vmatpush.msrb.mxu1 %v351_v13  ;;  %456 = vmatpush.msra.mxu3 %v348_v14  ;;  %v427_v52 = vld [vmem:[%s1151_s3 + $0x2a8] sm:$0xff]  ;;  %v412_v4 = vld [vmem:[%s1151_s3 + $0x230] sm:$0xff]  ;;  %v406_v13 = vld [vmem:[%s1151_s3 + $0x200] sm:$0xff] }
 0x17b   :  { %v245_v29 = vmax.f32 %v207_v17, 0.0  ;;  %v246_v30 = vmax.f32 %v236_v18, 0.0  ;;  %v349_v17 = vld [vmem:[%s1151_s3 + $0x38] sm:$0xff]  ;;  %v346_v18 = vld [vmem:[%s1151_s3 + $0x20] sm:$0xff]  ;;  %v383_v14 = vld [vmem:[%s1151_s3 + $0x148] sm:$0xff] }
 0x17c   :  { %525 = vmatpush.msrb.mxu1 %v349_v17  ;;  %457 = vmatpush.msra.mxu3 %v346_v18  ;;  %v407_v17 = vld [vmem:[%s1151_s3 + $0x208] sm:$0xff] }
 0x17d   :  { %v251_v43 = vmax.f32 %v245_v29, %v246_v30  ;;  %v343_v29 = vld [vmem:[%s1151_s3 + $0x8] sm:$0xff]  ;;  %v428_v30 = vld [vmem:[%s1151_s3 + $0x2b0] sm:$0xff] }
 0x17e   :  { %526 = vmatpush.msrb.mxu1 %v347_v21  ;;  %458 = vmatpush.msra.mxu3 %v344_v22  ;;  %v379_v18 = vld [vmem:[%s1151_s3 + $0x128] sm:$0xff] }
 0x17f   :  { %v260_v53 = vrot.slane %v251_v43, 1 }
 0x180   :  { %v209_v31 = vpop.f32.mrf.mxu0  ;;  %v238_v32 = vpop.f32.mrf.mxu1  ;;  %527 = vmatpush.msrb.mxu1 %v345_v25  ;;  %459 = vmatpush.msra.mxu3 %v342_v27 }
 0x181   :  { %v210_v37 = vadd.f32 %v209_v31, %v166_v15  ;;  %v239_v38 = vadd.f32 %v238_v32, %v167_v16  ;;  %v261_v0 = vsel %vm81_vm0, %v258_v57, %v260_v53  ;;  %v434_v15 = vld [vmem:[%s1151_s3 + $0x2e0] sm:$0xff]  ;;  %v405_v31 = vld [vmem:[%s1151_s3 + $0x1f8] sm:$0xff] }
 0x182   :  { %v270_v5 = vmax.f32 %v250_v48, %v261_v0  ;;  %v402_v16 = vld [vmem:[%s1151_s3 + $0x1e0] sm:$0xff]  ;;  %491 = vmatpush.msrb.mxu0 %v434_v15  ;;  %528 = vmatpush.msrb.mxu1 %v343_v29  ;;  %v431_v48 = vld [vmem:[%s1151_s3 + $0x2c8] sm:$0xff]  ;;  %v409_v15 = vld [vmem:[%s1151_s3 + $0x218] sm:$0xff] }
 0x183   :  { %v247_v44 = vmax.f32 %v210_v37, 0.0  ;;  %v248_v45 = vmax.f32 %v239_v38, 0.0  ;;  %v394_v32 = vld [vmem:[%s1151_s3 + $0x1a0] sm:$0xff]  ;;  %536 = vmatpush.msrb.mxu3 %v405_v31  ;;  %v424_v37 = vld [vmem:[%s1151_s3 + $0x290] sm:$0xff]  ;;  %v401_v38 = vld [vmem:[%s1151_s3 + $0x1d8] sm:$0xff]  ;;  %v334_v31 = vpop.permute.xlu0 %333 }
 0x184   :  { %492 = vmatpush.msrb.mxu0 %v432_v19  ;;  %559 = vmatpush.msra.mxu1 %v437_v36  ;;  %v374_v57 = vld [vmem:[%s1151_s3 + $0x100] sm:$0xff]  ;;  %v419_v0 = vld [vmem:[%s1151_s3 + $0x268] sm:$0xff]  ;;  %v377_v19 = vld [vmem:[%s1151_s3 + $0x118] sm:$0xff] }
 0x185   :  { %v252_v49 = vmax.f32 %v247_v44, %v248_v45  ;;  %537 = vmatpush.msrb.mxu3 %v403_v34  ;;  %v433_v44 = vld [vmem:[%s1151_s3 + $0x2d8] sm:$0xff]  ;;  %v420_v45 = vld [vmem:[%s1151_s3 + $0x270] sm:$0xff] }
 0x186   :  { %493 = vmatpush.msrb.mxu0 %v430_v23  ;;  %560 = vmatpush.msra.mxu1 %v435_v40  ;;  %v317_v23 = vpop.permute.xlu1 %316 }
 0x187   :  { %v262_v54 = vrot.slane %v252_v49, 1  ;;  %538 = vmatpush.msrb.mxu3 %v401_v38 }
 0x188   :  { %494 = vmatpush.msrb.mxu0 %v428_v30  ;;  %561 = vmatpush.msra.mxu1 %v433_v44  ;;  %v322_v30 = vpop.permute.xlu2 %321 }
 0x189   :  { %v268_v58 = vsel %vm81_vm0, %v262_v54, 0.0  ;;  %v263_v59 = vsel %vm81_vm0, %v260_v53, %v262_v54  ;;  %539 = vmatpush.msrb.mxu3 %v399_v42  ;;  %v380_v53 = vld [vmem:[%s1151_s3 + $0x130] sm:$0xff]  ;;  %v425_v54 = vld [vmem:[%s1151_s3 + $0x298] sm:$0xff]  ;;  %v438_v42 = vld [vmem:[%s1153_s4] sm:$0x3] }
 0x18a   :  { %v272_v60 = vmax.f32 %v252_v49, %v268_v58  ;;  %v271_v1 = vmax.f32 %v251_v43, %v263_v59  ;;  %495 = vmatpush.msrb.mxu0 %v426_v33  ;;  %v388_v43 = vld [vmem:[%s1151_s3 + $0x170] sm:$0xff]  ;;  %562 = vmatpush.msra.mxu1 %v431_v48  ;;  %v423_v58 = vld [vmem:[%s1151_s3 + $0x288] sm:$0xff]  ;;  %v418_v59 = vld [vmem:[%s1151_s3 + $0x260] sm:$0xff] }
 0x18b   :  { %v384_v49 = vld [vmem:[%s1151_s3 + $0x150] sm:$0xff]  ;;  %540 = vmatpush.msrb.mxu3 %v397_v46  ;;  %v440_v46 = vperm.slane %v438_v42, 0 }
 0x18c   :  { %293 = vmatpush.msra.mxu2 %v272_v60  ;;  %496 = vmatpush.msrb.mxu0 %v424_v37  ;;  %v395_v60 = vld [vmem:[%s1151_s3 + $0x1a8] sm:$0xff] }
 0x18d   :  { %563 = vmatpush.msra.mxu1 %v429_v50  ;;  %541 = vmatpush.msrb.mxu3 %v395_v60 }
 0x18e   :  { %294 = vmatpush.msra.mxu2 %v271_v1  ;;  %497 = vmatpush.msrb.mxu0 %v422_v41  ;;  %v414_v1 = vld [vmem:[%s1151_s3 + $0x240] sm:$0xff]  ;;  %v338_v34 = vpop.permute.xlu1 %337 }
 0x18f   :  { %564 = vmatpush.msra.mxu1 %v427_v52  ;;  %542 = vmatpush.msrb.mxu3 %v393_v63 }
 0x190   :  { %295 = vmatpush.msra.mxu2 %v270_v5  ;;  %498 = vmatpush.msrb.mxu0 %v420_v45  ;;  %v389_v5 = vld [vmem:[%s1151_s3 + $0x178] sm:$0xff]  ;;  %v441_v45 = vperm.slane %v438_v42, 1 }
 0x191   :  { %565 = vmatpush.msra.mxu1 %v425_v54  ;;  %543 = vmatpush.msrb.mxu3 %v391_v2 }
 0x192   :  { %296 = vmatpush.msra.mxu2 %v269_v8  ;;  %499 = vmatpush.msrb.mxu0 %v418_v59  ;;  %v387_v8 = vld [vmem:[%s1151_s3 + $0x168] sm:$0xff] }
 0x193   :  { %635 = vmatmul.msk.f32.vlgmr.msra.gmra.mxu2 %vm147_vm3, %v273_v9  ;;  %566 = vmatpush.msra.mxu1 %v423_v58  ;;  %v413_v9 = vld [vmem:[%s1151_s3 + $0x238] sm:$0xff] }
 0x194   :  { %467 = vmatpush.msrb.mxu2 %v404_v12  ;;  %500 = vmatpush.msrb.mxu0 %v416_v62  ;;  %v411_v12 = vld [vmem:[%s1151_s3 + $0x228] sm:$0xff] }
 0x195   :  { %567 = vmatpush.msra.mxu1 %v421_v61  ;;  %544 = vmatpush.msrb.mxu3 %v389_v5 }
 0x196   :  { %468 = vmatpush.msrb.mxu2 %v402_v16  ;;  %501 = vmatpush.msrb.mxu0 %v414_v1  ;;  %v381_v16 = vld [vmem:[%s1151_s3 + $0x138] sm:$0xff] }
 0x197   :  { %568 = vmatpush.msra.mxu1 %v419_v0  ;;  %545 = vmatpush.msrb.mxu3 %v387_v8 }
 0x198   :  { %469 = vmatpush.msrb.mxu2 %v400_v20  ;;  %502 = vmatpush.msrb.mxu0 %v412_v4  ;;  %v375_v20 = vld [vmem:[%s1151_s3 + $0x108] sm:$0xff] }
 0x199   :  { %569 = vmatpush.msra.mxu1 %v417_v3  ;;  %546 = vmatpush.msrb.mxu3 %v385_v11 }
 0x19a   :  { %470 = vmatpush.msrb.mxu2 %v398_v24  ;;  %503 = vmatpush.msrb.mxu0 %v410_v7 }
 0x19b   :  { %636 = vmatmul.msk.f32.gmra.mxu2 %vm147_vm3, %v274_v26  ;;  %570 = vmatpush.msra.mxu1 %v415_v6 }
 0x19c   :  { %471 = vmatpush.msrb.mxu2 %v396_v28  ;;  %504 = vmatpush.msrb.mxu0 %v408_v10 }
 0x19d   :  { %571 = vmatpush.msra.mxu1 %v413_v9  ;;  %547 = vmatpush.msrb.mxu3 %v383_v14  ;;  %v598_v14 = vld [vmem:[%s1154_s6] sm:$0xff] }
 0x19e   :  { %472 = vmatpush.msrb.mxu2 %v394_v32  ;;  %505 = vmatpush.msrb.mxu0 %v406_v13 }
 0x19f   :  { %572 = vmatpush.msra.mxu1 %v411_v12  ;;  %548 = vmatpush.msrb.mxu3 %v381_v16 }
 0x1a0   :  { %473 = vmatpush.msrb.mxu2 %v392_v35 }
 0x1a1   :  { %573 = vmatpush.msra.mxu1 %v409_v15  ;;  %549 = vmatpush.msrb.mxu3 %v379_v18 }
 0x1a2   :  { %474 = vmatpush.msrb.mxu2 %v390_v39 }
 0x1a3   :  { %574 = vmatpush.msra.mxu1 %v407_v17  ;;  %550 = vmatpush.msrb.mxu3 %v377_v19 }
 0x1a4   :  { %475 = vmatpush.msrb.mxu2 %v388_v43 }
 0x1a5   :  { %551 = vmatpush.msrb.mxu3 %v375_v20 }
 0x1a6   :  { %476 = vmatpush.msrb.mxu2 %v386_v47 }
 0x1a8   :  { %477 = vmatpush.msrb.mxu2 %v384_v49 }
 0x1aa   :  { %478 = vmatpush.msrb.mxu2 %v382_v51 }
 0x1ac   :  { %479 = vmatpush.msrb.mxu2 %v380_v53 }
 0x1ae   :  { %480 = vmatpush.msrb.mxu2 %v378_v55 }
 0x1b0   :  { %481 = vmatpush.msrb.mxu2 %v376_v56 }
 0x1b2   :  { %482 = vmatpush.msrb.mxu2 %v374_v57 }
 0x1b4   :  { %638 = vmatpush.msra.mxu2 %v437_v36 }
 0x1b6   :  { %639 = vmatpush.msra.mxu2 %v435_v40 }
 0x1b8   :  { %640 = vmatpush.msra.mxu2 %v433_v44 }
 0x1ba   :  { %641 = vmatpush.msra.mxu2 %v431_v48 }
 0x1bc   :  { %642 = vmatpush.msra.mxu2 %v429_v50 }
 0x1be   :  { %643 = vmatpush.msra.mxu2 %v427_v52 }
 0x1c0   :  { %644 = vmatpush.msra.mxu2 %v425_v54 }
 0x1c2   :  { %645 = vmatpush.msra.mxu2 %v423_v58 }
 0x1c4   :  { %646 = vmatpush.msra.mxu2 %v421_v61 }
 0x1c6   :  { %647 = vmatpush.msra.mxu2 %v419_v0 }
 0x1c8   :  { %648 = vmatpush.msra.mxu2 %v417_v3 }
 0x1ca   :  { %649 = vmatpush.msra.mxu2 %v415_v6 }
 0x1cc   :  { %650 = vmatpush.msra.mxu2 %v413_v9 }
 0x1ce   :  { %651 = vmatpush.msra.mxu2 %v411_v12 }
 0x1d0   :  { %652 = vmatpush.msra.mxu2 %v409_v15 }
 0x1d2   :  { %653 = vmatpush.msra.mxu2 %v407_v17 }
 0x216   :  { %v298_v21 = vpop.f32.mrf.mxu2 }
 0x217   :  { %483 = vmatmul.f32.vlgmr.msrb.gmra.mxu2 %v298_v21  ;;  %v308_v22 = vrot.slane %v298_v21, 7  ;;  %v326_v27 = vrot.slane %v298_v21, 1 }
 0x219   :  { %v313_v24 = vsel %vm44_vm1, 0.0, %v308_v22 }
 0x21a   :  { %v324_v25 = vmul.f32 %v317_v23, %v313_v24 }
 0x21c   :  { %460 = vmatmul.f32.vlgmr.msra.gmra.mxu3 %v324_v25  ;;  %529 = vmatmul.f32.vlgmr.msrb.gmra.mxu1 %v324_v25 }
 0x21e   :  { %v301_v26 = vpop.f32.mrf.mxu2 }
 0x21f   :  { %v309_v28 = vrot.slane %v301_v26, 7  ;;  %486 = vmatmul.f32.gmra.mxu2 %v301_v26  ;;  %v327_v29 = vrot.slane %v301_v26, 1 }
 0x221   :  { %v310_v32 = vsel %vm44_vm1, %v308_v22, %v309_v28  ;;  %v328_v33 = vsel %vm81_vm0, %v326_v27, %v327_v29  ;;  %v331_v35 = vsel %vm81_vm0, %v327_v29, 0.0 }
 0x222   :  { %v325_v36 = vmul.f32 %v322_v30, %v310_v32  ;;  %v340_v37 = vmul.f32 %v334_v31, %v328_v33  ;;  %v341_v38 = vmul.f32 %v338_v34, %v331_v35 }
 0x224   :  { %463 = vmatmul.f32.gmra.mxu3 %v325_v36  ;;  %506 = vmatmul.f32.vlgmr.msrb.gmra.mxu0 %v340_v37 }
 0x225   :  { %532 = vmatmul.f32.gmra.mxu1 %v325_v36 }
 0x227   :  { %578 = vmatmul.f32.vlgmr.msra.gmra.mxu2 %v341_v38 }
 0x22c   :  { %509 = vmatmul.f32.gmra.mxu0 %v341_v38  ;;  %552 = vmatmul.f32.vlgmr.msrb.gmra.mxu3 %v298_v21 }
 0x22d   :  { %575 = vmatmul.f32.vlgmr.msra.gmra.mxu1 %v340_v37 }
 0x234   :  { %555 = vmatmul.f32.gmra.mxu3 %v301_v26 }
 0x299   :  { %v530_v39 = vpop.f32.mrf.mxu1 }
 0x29a   :  { %v484_v41 = vpop.f32.mrf.mxu2  ;;  %v531_v48 = vadd.f32 %v530_v39, %v441_v45 }
 0x29f   :  { %v461_v40 = vpop.f32.mrf.mxu3 }
 0x2a0   :  { %v462_v49 = vadd.f32 %v461_v40, %v440_v46 }
 0x2a1   :  { %v507_v47 = vpop.f32.mrf.mxu0 }
 0x2a2   :  { %v533_v44 = vpop.f32.mrf.mxu1  ;;  %v487_v50 = vpop.f32.mrf.mxu2  ;;  %v485_v54 = vadd.f32 %v484_v41, %v462_v49 }
 0x2a3   :  { %v534_v59 = vadd.f32 %v533_v44, %v441_v45 }
 0x2a4   :  { %v508_v58 = vadd.f32 %v507_v47, %v485_v54 }
 0x2a6   :  { %v582_v2 = vmax.f32 %v508_v58, 0.0 }
 0x2a7   :  { %v464_v43 = vpop.f32.mrf.mxu3 }
 0x2a8   :  { %v465_v52 = vadd.f32 %v464_v43, %v440_v46 }
 0x2a9   :  { %v510_v60 = vpop.f32.mrf.mxu0 }
 0x2aa   :  { %v576_v55 = vpop.f32.mrf.mxu1  ;;  %v488_v56 = vadd.f32 %v487_v50, %v465_v52  ;;  %v579_v1 = vpop.f32.mrf.mxu2 }
 0x2ac   :  { %v511_v62 = vadd.f32 %v510_v60, %v488_v56 }
 0x2ae   :  { %v584_v4 = vmax.f32 %v511_v62, 0.0 }
 0x2af   :  { %v553_v51 = vpop.f32.mrf.mxu3 }
 0x2b0   :  { %v554_v53 = vadd.f32 %v553_v51, %v531_v48 }
 0x2b2   :  { %v577_v57 = vadd.f32 %v576_v55, %v554_v53 }
 0x2b4   :  { %v583_v63 = vmax.f32 %v577_v57, 0.0 }
 0x2b6   :  { %v586_v5 = vmax.f32 %v582_v2, %v583_v63 }
 0x2b7   :  { %v556_v61 = vpop.f32.mrf.mxu3 }
 0x2b8   :  { %v557_v0 = vadd.f32 %v556_v61, %v534_v59  ;;  %v590_v8 = vrot.slane %v586_v5, 1 }
 0x2ba   :  { %v580_v3 = vadd.f32 %v579_v1, %v557_v0 }
 0x2bc   :  { %v585_v6 = vmax.f32 %v580_v3, 0.0 }
 0x2be   :  { %v587_v7 = vmax.f32 %v584_v4, %v585_v6 }
 0x2c0   :  { %v591_v9 = vrot.slane %v587_v7, 1 }
 0x2c2   :  { %v595_v10 = vsel %vm81_vm0, %v591_v9, 0.0  ;;  %v592_v11 = vsel %vm81_vm0, %v590_v8, %v591_v9 }
 0x2c3   :  { %v597_v12 = vmax.f32 %v587_v7, %v595_v10  ;;  %v596_v13 = vmax.f32 %v586_v5, %v592_v11 }
 0x2c5   :  { %616 = vmatpush.msra.mxu0 %v597_v12 }
 0x2c7   :  { %617 = vmatpush.msra.mxu0 %v596_v13 }
 0x2c8   :  { %637 = vmatmul.msk.f32.vlgmr.msra.gmra.mxu0 %vm142_vm2, %v598_v14 }
 0x345   :  { %v619_v15 = vpop.f32.mrf.mxu0 }
 0x346   :  { %622 = vst [vmem:[%s1155_s9] sm:$0xff] %v619_v15 }

</bundles_post_ra>
